<compile_context>
chip_gen: v6e
topology: v6e:2x2x1
jax: 0.10.0
libtpu: 0.0.40
codegen_flags: <defaults>
</compile_context>

<pallas_src>
import functools

import jax
import jax.numpy as jnp
from jax.experimental import pallas as pl
from jax.experimental.pallas import tpu as pltpu

_EPS = 1e-7
_ALPHA = 0.25
_LANES = 128
_SUBLANES = 8
_NUM_SPLITS = 2           # leading "parallel" grid axis (2 TCs on v7x)
_TARGET_REG_ROWS = 1024   # ~512 KiB per f32 regression buffer per grid step


def _loss_kernel(n_cls_ref,
                 cls_p_ref, cls_t_ref, reg_p_ref, reg_t_ref,
                 cls_out_ref, reg_out_ref, *, nb):
    c = pl.program_id(0)
    k = pl.program_id(1)

    # Output blocks are resident across the reduction axis k -> accumulators.
    @pl.when(k == 0)
    def _init():
        cls_out_ref[...] = jnp.zeros_like(cls_out_ref)
        reg_out_ref[...] = jnp.zeros_like(reg_out_ref)

    # ---------------- focal loss (classification head) ----------------
    p = cls_p_ref[...].astype(jnp.float32)
    t = cls_t_ref[...].astype(jnp.float32)

    pt_1 = jnp.clip(jnp.where(t == 1.0, p, 1.0), _EPS, 1.0 - _EPS)
    pt_0 = jnp.clip(jnp.where(t == 0.0, p, 0.0), _EPS, 1.0 - _EPS)

    one_m = 1.0 - pt_1  # gamma == 2 -> explicit squaring on the VPU, not pow/EUP
    term = (_ALPHA * (one_m * one_m) * jnp.log(pt_1)
            + (1.0 - _ALPHA) * (pt_0 * pt_0) * jnp.log(1.0 - pt_0))

    # In-kernel validity mask for the zero-padded tail (no mask array in HBM).
    ct = cls_p_ref.shape[0]
    row = jax.lax.broadcasted_iota(jnp.int32, (ct, _LANES), 0)
    lane = jax.lax.broadcasted_iota(jnp.int32, (ct, _LANES), 1)
    idx = ((c * nb + k) * ct + row) * _LANES + lane
    term = jnp.where(idx < n_cls_ref[0], term, 0.0)

    # Collapse rows onto an (8,128) lane-parallel partial: pure VPU adds; the
    # single cross-lane reduce is paid once, in the wrapper.
    cls_part = (-term).reshape(ct // _SUBLANES, _SUBLANES, _LANES).sum(axis=0)
    cls_out_ref[...] += cls_part[None]

    # ---------------- L1-sum loss (regression head) ----------------
    # Padding is zeros in both pred and target -> |diff| is exactly 0, no mask.
    diff = jnp.abs(reg_p_ref[...].astype(jnp.float32)
                   - reg_t_ref[...].astype(jnp.float32))
    rt = reg_p_ref.shape[0]
    reg_part = diff.reshape(rt // _SUBLANES, _SUBLANES, _LANES).sum(axis=0)
    reg_out_ref[...] += reg_part[None]


def _rows_per_step(n_elems, nb):
    rows = pl.cdiv(n_elems, _LANES)
    rps = pl.cdiv(rows, _NUM_SPLITS * nb)
    return max(_SUBLANES, ((rps + _SUBLANES - 1) // _SUBLANES) * _SUBLANES)


def _to_slab(x, rows_per_step, nb):
    """Flatten into a lane-dense [rows, 128] slab, zero-padded so that
    rows == rows_per_step * _NUM_SPLITS * nb.  Keeps the input dtype (no upcast
    in HBM); the kernel casts each tile to f32."""
    flat = x.reshape(-1)
    total = rows_per_step * _NUM_SPLITS * nb * _LANES
    if flat.shape[0] != total:  # skip the pad copy when already aligned
        flat = jnp.pad(flat, (0, total - flat.shape[0]))
    return flat.reshape(-1, _LANES)


def custom_loss(cls_pred, reg_pred, cls_target, reg_target):
    batch_size = reg_target.shape[0]
    n_cls = int(cls_pred.size)
    n_reg = int(reg_pred.size)

    # Grid sized off the dominant (regression) stream.
    reg_rows = pl.cdiv(n_reg, _LANES)
    nb = max(1, pl.cdiv(reg_rows, _NUM_SPLITS * _TARGET_REG_ROWS))

    ct = _rows_per_step(n_cls, nb)
    rt = _rows_per_step(n_reg, nb)

    cls_p = _to_slab(cls_pred, ct, nb)
    cls_t = _to_slab(cls_target, ct, nb)
    reg_p = _to_slab(reg_pred, rt, nb)
    reg_t = _to_slab(reg_target, rt, nb)

    n_valid = jnp.array([n_cls], jnp.int32)

    bytes_in = ((cls_p.size + cls_t.size) * cls_p.dtype.itemsize
                + (reg_p.size + reg_t.size) * reg_p.dtype.itemsize)
    cost = pl.CostEstimate(flops=12 * n_cls + 3 * n_reg,
                           transcendentals=2 * n_cls,
                           bytes_accessed=bytes_in)

    stream_map = lambda c, k, n_ref: (c * nb + k, 0)
    out_map = lambda c, k, n_ref: (c, 0, 0)

    cls_out, reg_out = pl.pallas_call(
        functools.partial(_loss_kernel, nb=nb),
        out_shape=(jax.ShapeDtypeStruct((_NUM_SPLITS, _SUBLANES, _LANES),
                                        jnp.float32),
                   jax.ShapeDtypeStruct((_NUM_SPLITS, _SUBLANES, _LANES),
                                        jnp.float32)),
        grid_spec=pltpu.PrefetchScalarGridSpec(
            num_scalar_prefetch=1,
            grid=(_NUM_SPLITS, nb),
            in_specs=[
                pl.BlockSpec((ct, _LANES), stream_map),
                pl.BlockSpec((ct, _LANES), stream_map),
                pl.BlockSpec((rt, _LANES), stream_map),
                pl.BlockSpec((rt, _LANES), stream_map),
            ],
            out_specs=(pl.BlockSpec((1, _SUBLANES, _LANES), out_map),
                       pl.BlockSpec((1, _SUBLANES, _LANES), out_map)),
        ),
        compiler_params=pltpu.CompilerParams(
            dimension_semantics=("parallel", "arbitrary")),
        cost_estimate=cost,
    )(n_valid, cls_p, cls_t, reg_p, reg_t)

    inv_b = 1.0 / float(batch_size)
    cls_loss = jnp.sum(cls_out) * inv_b   # single cross-lane reduce, done once
    reg_loss = jnp.sum(reg_out) * inv_b
    return cls_loss, reg_loss


def _reference(cls_pred, reg_pred, cls_target, reg_target):
    """Plain-JAX mirror of the PyTorch forward, for sanity checking."""
    b = reg_target.shape[0]
    p = cls_pred.astype(jnp.float32)
    t = cls_target.astype(jnp.float32)
    pt_1 = jnp.where(t == 1.0, p, jnp.ones_like(p))
    pt_0 = jnp.where(t == 0.0, p, jnp.zeros_like(p))
    pt_1 = jnp.clip(pt_1, _EPS, 1.0 - _EPS)
    pt_0 = jnp.clip(pt_0, _EPS, 1.0 - _EPS)
    s1 = jnp.sum(_ALPHA * (1.0 - pt_1) ** 2 * jnp.log(pt_1))
    s0 = jnp.sum((1.0 - _ALPHA) * pt_0 ** 2 * jnp.log(1.0 - pt_0))
    cls_loss = -(s1 + s0) / b
    reg_loss = jnp.sum(jnp.abs(reg_pred - reg_target)) / b
    return cls_loss, reg_loss


if __name__ == "__main__":
    key = jax.random.PRNGKey(0)
    k1, k2, k3, k4 = jax.random.split(key, 4)

    B, H, W = 2, 16, 16
    NUM_CLASSES = 1
    REG_CH = 6  # PIXOR regression head channels

    # classification predictions in (0,1) (post-sigmoid), binary targets
    cls_pred = jax.random.uniform(k1, (B, NUM_CLASSES, H, W), jnp.float32,
                                  minval=0.01, maxval=0.99)
    cls_target = (jax.random.uniform(k2, (B, NUM_CLASSES, H, W)) > 0.8
                  ).astype(jnp.float32)
    reg_pred = jax.random.normal(k3, (B, REG_CH, H, W), jnp.float32)
    reg_target = jax.random.normal(k4, (B, REG_CH, H, W), jnp.float32)

    cls_loss, reg_loss = jax.jit(custom_loss)(cls_pred, reg_pred,
                                              cls_target, reg_target)
    jax.block_until_ready((cls_loss, reg_loss))

    ref_cls, ref_reg = _reference(cls_pred, reg_pred, cls_target, reg_target)
    assert jnp.allclose(cls_loss, ref_cls, rtol=1e-4, atol=1e-4), (cls_loss, ref_cls)
    assert jnp.allclose(reg_loss, ref_reg, rtol=1e-4, atol=1e-4), (reg_loss, ref_reg)

    print("KERNEL_OK")
</pallas_src>

<mosaic_0001>
module attributes {stable_mosaic.version = 11 : i64} {
  func.func @_loss_kernel(%arg0: i32, %arg1: i32, %arg2: memref<1xi32, #tpu.memory_space<smem>>, %arg3: memref<8x128xf32, #tpu.memory_space<vmem>>, %arg4: memref<8x128xf32, #tpu.memory_space<vmem>>, %arg5: memref<16x128xf32, #tpu.memory_space<vmem>>, %arg6: memref<16x128xf32, #tpu.memory_space<vmem>>, %arg7: memref<1x8x128xf32, #tpu.memory_space<vmem>>, %arg8: memref<1x8x128xf32, #tpu.memory_space<vmem>>) attributes {dimension_semantics = [#tpu.dimension_semantics<parallel>, #tpu.dimension_semantics<arbitrary>], iteration_bounds = array<i64: 2, 1>, scalar_prefetch = 1 : i64, scratch_operands = 0 : i64, tpu.core_type = #tpu.core_type<tc>, window_params = [{transform_indices = @transform_0, window_bounds = array<i64: 8, 128>}, {transform_indices = @transform_1, window_bounds = array<i64: 8, 128>}, {transform_indices = @transform_2, window_bounds = array<i64: 16, 128>}, {transform_indices = @transform_3, window_bounds = array<i64: 16, 128>}, {transform_indices = @transform_4, window_bounds = array<i64: 1, 8, 128>}, {transform_indices = @transform_5, window_bounds = array<i64: 1, 8, 128>}]} {
    %c0_i32 = arith.constant 0 : i32
    %0 = arith.cmpi eq, %arg1, %c0_i32 : i32
    %1 = arith.extui %0 : i1 to i32
    %c0_i32_0 = arith.constant 0 : i32
    %2 = arith.cmpi ne, %1, %c0_i32_0 : i32
    scf.if %2 {
      %cst_36 = arith.constant 0.000000e+00 : f32
      %69 = vector.broadcast %cst_36 : f32 to vector<1x8x128xf32>
      %c0_37 = arith.constant 0 : index
      %c0_38 = arith.constant 0 : index
      %c0_39 = arith.constant 0 : index
      %70 = vector.load %arg7[%c0_37, %c0_38, %c0_39] : memref<1x8x128xf32, #tpu.memory_space<vmem>>, vector<1x8x128xf32>
      tpu.vector_store %arg7[%c0_37, %c0_38, %c0_39], %69 {strides = array<i32>} : memref<1x8x128xf32, #tpu.memory_space<vmem>>, vector<1x8x128xf32>,
      %cst_40 = arith.constant 0.000000e+00 : f32
      %71 = vector.broadcast %cst_40 : f32 to vector<1x8x128xf32>
      %c0_41 = arith.constant 0 : index
      %c0_42 = arith.constant 0 : index
      %c0_43 = arith.constant 0 : index
      %72 = vector.load %arg8[%c0_41, %c0_42, %c0_43] : memref<1x8x128xf32, #tpu.memory_space<vmem>>, vector<1x8x128xf32>
      tpu.vector_store %arg8[%c0_41, %c0_42, %c0_43], %71 {strides = array<i32>} : memref<1x8x128xf32, #tpu.memory_space<vmem>>, vector<1x8x128xf32>,
    } else {
    }
    %c0 = arith.constant 0 : index
    %c0_1 = arith.constant 0 : index
    %3 = vector.load %arg3[%c0, %c0_1] : memref<8x128xf32, #tpu.memory_space<vmem>>, vector<8x128xf32>
    %c0_2 = arith.constant 0 : index
    %c0_3 = arith.constant 0 : index
    %4 = vector.load %arg4[%c0_2, %c0_3] : memref<8x128xf32, #tpu.memory_space<vmem>>, vector<8x128xf32>
    %cst = arith.constant 1.000000e+00 : f32
    %5 = vector.broadcast %cst : f32 to vector<8x128xf32>
    %6 = arith.cmpf oeq, %4, %5 : vector<8x128xf32>
    %cst_4 = arith.constant 1.000000e+00 : f32
    %7 = vector.broadcast %cst_4 : f32 to vector<8x128xf32>
    %8 = arith.select %6, %3, %7 : vector<8x128xi1>, vector<8x128xf32>
    %cst_5 = arith.constant 1.000000e-07 : f32
    %cst_6 = arith.constant 0.99999988 : f32
    %9 = vector.broadcast %cst_5 : f32 to vector<8x128xf32>
    %10 = arith.maximumf %9, %8 : vector<8x128xf32>
    %11 = vector.broadcast %cst_6 : f32 to vector<8x128xf32>
    %12 = arith.minimumf %11, %10 : vector<8x128xf32>
    %cst_7 = arith.constant 0.000000e+00 : f32
    %13 = vector.broadcast %cst_7 : f32 to vector<8x128xf32>
    %14 = arith.cmpf oeq, %4, %13 : vector<8x128xf32>
    %cst_8 = arith.constant 0.000000e+00 : f32
    %15 = vector.broadcast %cst_8 : f32 to vector<8x128xf32>
    %16 = arith.select %14, %3, %15 : vector<8x128xi1>, vector<8x128xf32>
    %cst_9 = arith.constant 1.000000e-07 : f32
    %cst_10 = arith.constant 0.99999988 : f32
    %17 = vector.broadcast %cst_9 : f32 to vector<8x128xf32>
    %18 = arith.maximumf %17, %16 : vector<8x128xf32>
    %19 = vector.broadcast %cst_10 : f32 to vector<8x128xf32>
    %20 = arith.minimumf %19, %18 : vector<8x128xf32>
    %cst_11 = arith.constant 1.000000e+00 : f32
    %21 = vector.broadcast %cst_11 : f32 to vector<8x128xf32>
    %22 = arith.subf %21, %12 : vector<8x128xf32>
    %23 = arith.mulf %22, %22 : vector<8x128xf32>
    %cst_12 = arith.constant 2.500000e-01 : f32
    %24 = vector.broadcast %cst_12 : f32 to vector<8x128xf32>
    %25 = arith.mulf %24, %23 : vector<8x128xf32>
    %26 = math.log %12 : vector<8x128xf32>
    %27 = arith.mulf %25, %26 : vector<8x128xf32>
    %28 = arith.mulf %20, %20 : vector<8x128xf32>
    %cst_13 = arith.constant 7.500000e-01 : f32
    %29 = vector.broadcast %cst_13 : f32 to vector<8x128xf32>
    %30 = arith.mulf %29, %28 : vector<8x128xf32>
    %cst_14 = arith.constant 1.000000e+00 : f32
    %31 = vector.broadcast %cst_14 : f32 to vector<8x128xf32>
    %32 = arith.subf %31, %20 : vector<8x128xf32>
    %33 = math.log %32 : vector<8x128xf32>
    %34 = arith.mulf %30, %33 : vector<8x128xf32>
    %35 = arith.addf %27, %34 : vector<8x128xf32>
    %36 = tpu.iota {dimensions = array<i32: 0>} : vector<8x128xi32>
    %37 = tpu.iota {dimensions = array<i32: 1>} : vector<8x128xi32>
    %c1_i32 = arith.constant 1 : i32
    %38 = arith.muli %arg0, %c1_i32 : i32
    %39 = arith.addi %38, %arg1 : i32
    %c8_i32 = arith.constant 8 : i32
    %40 = arith.muli %39, %c8_i32 : i32
    %41 = vector.broadcast %40 : i32 to vector<8x128xi32>
    %42 = arith.addi %41, %36 : vector<8x128xi32>
    %c128_i32 = arith.constant 128 : i32
    %43 = vector.broadcast %c128_i32 : i32 to vector<8x128xi32>
    %44 = arith.muli %42, %43 : vector<8x128xi32>
    %45 = arith.addi %44, %37 : vector<8x128xi32>
    %c0_15 = arith.constant 0 : index
    %46 = memref.load %arg2[%c0_15] : memref<1xi32, #tpu.memory_space<smem>>
    %47 = vector.broadcast %46 : i32 to vector<8x128xi32>
    %48 = arith.cmpi slt, %45, %47 : vector<8x128xi32>
    %cst_16 = arith.constant 0.000000e+00 : f32
    %49 = vector.broadcast %cst_16 : f32 to vector<8x128xf32>
    %50 = arith.select %48, %35, %49 : vector<8x128xi1>, vector<8x128xf32>
    %cst_17 = arith.constant 0.000000e+00 : f32
    %51 = vector.broadcast %cst_17 : f32 to vector<8x128xf32>
    %52 = arith.subf %51, %50 : vector<8x128xf32>
    %53 = vector.shape_cast %52 : vector<8x128xf32> to vector<1x8x128xf32>
    %cst_18 = arith.constant dense<0.000000e+00> : vector<8x128xf32>
    %54 = vector.multi_reduction <add>, %53, %cst_18 [0] : vector<1x8x128xf32> to vector<8x128xf32>
    %c0_19 = arith.constant 0 : index
    %c0_20 = arith.constant 0 : index
    %c0_21 = arith.constant 0 : index
    %55 = vector.load %arg7[%c0_19, %c0_20, %c0_21] : memref<1x8x128xf32, #tpu.memory_space<vmem>>, vector<1x8x128xf32>
    %56 = vector.shape_cast %54 : vector<8x128xf32> to vector<1x8x128xf32>
    %57 = arith.addf %55, %56 : vector<1x8x128xf32>
    %c0_22 = arith.constant 0 : index
    %c0_23 = arith.constant 0 : index
    %c0_24 = arith.constant 0 : index
    %58 = vector.load %arg7[%c0_22, %c0_23, %c0_24] : memref<1x8x128xf32, #tpu.memory_space<vmem>>, vector<1x8x128xf32>
    tpu.vector_store %arg7[%c0_22, %c0_23, %c0_24], %57 {strides = array<i32>} : memref<1x8x128xf32, #tpu.memory_space<vmem>>, vector<1x8x128xf32>,
    %c0_25 = arith.constant 0 : index
    %c0_26 = arith.constant 0 : index
    %59 = vector.load %arg5[%c0_25, %c0_26] : memref<16x128xf32, #tpu.memory_space<vmem>>, vector<16x128xf32>
    %c0_27 = arith.constant 0 : index
    %c0_28 = arith.constant 0 : index
    %60 = vector.load %arg6[%c0_27, %c0_28] : memref<16x128xf32, #tpu.memory_space<vmem>>, vector<16x128xf32>
    %61 = arith.subf %59, %60 : vector<16x128xf32>
    %62 = math.absf %61 : vector<16x128xf32>
    %63 = vector.shape_cast %62 : vector<16x128xf32> to vector<2x8x128xf32>
    %cst_29 = arith.constant dense<0.000000e+00> : vector<8x128xf32>
    %64 = vector.multi_reduction <add>, %63, %cst_29 [0] : vector<2x8x128xf32> to vector<8x128xf32>
    %c0_30 = arith.constant 0 : index
    %c0_31 = arith.constant 0 : index
    %c0_32 = arith.constant 0 : index
    %65 = vector.load %arg8[%c0_30, %c0_31, %c0_32] : memref<1x8x128xf32, #tpu.memory_space<vmem>>, vector<1x8x128xf32>
    %66 = vector.shape_cast %64 : vector<8x128xf32> to vector<1x8x128xf32>
    %67 = arith.addf %65, %66 : vector<1x8x128xf32>
    %c0_33 = arith.constant 0 : index
    %c0_34 = arith.constant 0 : index
    %c0_35 = arith.constant 0 : index
    %68 = vector.load %arg8[%c0_33, %c0_34, %c0_35] : memref<1x8x128xf32, #tpu.memory_space<vmem>>, vector<1x8x128xf32>
    tpu.vector_store %arg8[%c0_33, %c0_34, %c0_35], %67 {strides = array<i32>} : memref<1x8x128xf32, #tpu.memory_space<vmem>>, vector<1x8x128xf32>,
    return
  }
  func.func @transform_0(%arg0: i32, %arg1: i32, %arg2: memref<1xi32, #tpu.memory_space<smem>>) -> (i32, i32) {
    %c1_i32 = arith.constant 1 : i32
    %0 = arith.muli %arg0, %c1_i32 : i32
    %1 = arith.addi %0, %arg1 : i32
    %c0_i32 = arith.constant 0 : i32
    %c0_i32_0 = arith.constant 0 : i32
    return %1, %c0_i32 : i32, i32
  }
  func.func @transform_1(%arg0: i32, %arg1: i32, %arg2: memref<1xi32, #tpu.memory_space<smem>>) -> (i32, i32) {
    %c1_i32 = arith.constant 1 : i32
    %0 = arith.muli %arg0, %c1_i32 : i32
    %1 = arith.addi %0, %arg1 : i32
    %c0_i32 = arith.constant 0 : i32
    %c0_i32_0 = arith.constant 0 : i32
    return %1, %c0_i32 : i32, i32
  }
  func.func @transform_2(%arg0: i32, %arg1: i32, %arg2: memref<1xi32, #tpu.memory_space<smem>>) -> (i32, i32) {
    %c1_i32 = arith.constant 1 : i32
    %0 = arith.muli %arg0, %c1_i32 : i32
    %1 = arith.addi %0, %arg1 : i32
    %c0_i32 = arith.constant 0 : i32
    %c0_i32_0 = arith.constant 0 : i32
    return %1, %c0_i32 : i32, i32
  }
  func.func @transform_3(%arg0: i32, %arg1: i32, %arg2: memref<1xi32, #tpu.memory_space<smem>>) -> (i32, i32) {
    %c1_i32 = arith.constant 1 : i32
    %0 = arith.muli %arg0, %c1_i32 : i32
    %1 = arith.addi %0, %arg1 : i32
    %c0_i32 = arith.constant 0 : i32
    %c0_i32_0 = arith.constant 0 : i32
    return %1, %c0_i32 : i32, i32
  }
  func.func @transform_4(%arg0: i32, %arg1: i32, %arg2: memref<1xi32, #tpu.memory_space<smem>>) -> (i32, i32, i32) {
    %c0_i32 = arith.constant 0 : i32
    %c0_i32_0 = arith.constant 0 : i32
    %c0_i32_1 = arith.constant 0 : i32
    return %arg0, %c0_i32, %c0_i32_0 : i32, i32, i32
  }
  func.func @transform_5(%arg0: i32, %arg1: i32, %arg2: memref<1xi32, #tpu.memory_space<smem>>) -> (i32, i32, i32) {
    %c0_i32 = arith.constant 0 : i32
    %c0_i32_0 = arith.constant 0 : i32
    %c0_i32_1 = arith.constant 0 : i32
    return %arg0, %c0_i32, %c0_i32_0 : i32, i32, i32
  }
}

</mosaic_0001>

<bundles_post_ra>
// kernel: custom_loss.1
= control target key start
LH: loop header
LB: loop body
LE: loop exit
PB: predicated region body
PF: predicated region fallthrough
CT: control target
= control target key end

     0   :  { %s629_s23 = smov 0   ;;  %s631_s24 = smov 0   ;;  %s686_s0 = inlined_call_operand.<no memory space> [shape: s32[1], index: 0, kind: input, shape index: {}]   ;;  %s687_s1 = inlined_call_operand.vmem [shape: f32[16,128], index: 1, kind: input, shape index: {}]   ;;  %s688_s2 = inlined_call_operand.vmem [shape: f32[16,128], index: 2, kind: input, shape index: {}]   ;;  %s689_s3 = inlined_call_operand.vmem [shape: f32[32,128], index: 3, kind: input, shape index: {}]   ;;  %s690_s4 = inlined_call_operand.vmem [shape: f32[32,128], index: 4, kind: input, shape index: {}]   ;;  %s691_s5 = inlined_call_operand.vmem [shape: f32[2,8,128], index: 5, kind: output, shape index: {0}]   ;;  %s692_s6 = inlined_call_operand.vmem [shape: f32[2,8,128], index: 6, kind: output, shape index: {1}]  }
   0x1   :  { %12 = sst [smem:[#allocation3]] %s686_s0  ;;  %s633_s25 = smov 0  }
   0x2 LB: > { %s30_s0 = sadd.s32 1, %s585_s24  ;;  %p526_p0 = scmp.ge.s32.totalorder %s589_s25, 1  ;;  %s589_s25 = sphi %s633_s25, %s18_s25   ;;  %s585_s24 = sphi %s631_s24, %s694_s24   ;;  %s581_s23 = sphi %s629_s23, %s693_s23  }
   0x3   : > { %p32_p1 = scmp.ge.s32.totalorder %s30_s0, 2  ;;  %p250_p2 = scmp.lt.s32.totalorder %s589_s25, 3 }
   0x5   : > { %s696_s0 = smov (%p32_p1, %s30_s0), 0  ;;  %p251_p3 = pnand %p526_p0, %p250_p2 }
   0x6   : > { %p299_p4 = scmp.lt.s32.totalorder (!%p251_p3), %s581_s23, 1  ;;  %s529_s26 = sshll.u32 (!%p251_p3), %s581_s23, 1 }
   0x7   : > { %254 = sbr.rel (%p251_p3) target bundleno = 50 (0x32), region = 36  ;;  %p312_p5 = scmp.lt.s32.totalorder (!%p251_p3), %s529_s26, 3 }
   0x8   : > { %s535_s18 = sshll.u32 (!%p251_p3), %s581_s23, 3  ;;  %s373_s22 = sld [smem:[#allocation3]] (!%p251_p3) }
   0xc   : > { %s300_s27 = scalar_select %p299_p4, %s581_s23, 1  ;;  %v363_v10 = vlaneseq  ;;  %v369_v20 = vstv %s535_s18 }
   0xd   : > { %s698_s26 = smov (!%p312_p5, %s529_s26), 3 }
   0xe   : > { %s652_s28 = sshll.u32 %s300_s27, 3  ;;  %s530_s11 = sshll.u32 %s698_s26, 3  ;;  %v364_v16 = vshrl.u32 %v363_v10, 7  ;;  %v366_v25 = vand.u32 127, %v363_v10  ;;  %v374_v35 = vstv %s373_s22 }
   0xf   : > { %s302_s7 = scalar_lea.vmem %s687_s1, %s652_s28  ;;  %s308_s10 = scalar_lea.vmem %s688_s2, %s652_s28 }
  0x10   : > { %v340_v0 = vld [vmem:[%s302_s7] sm:$0xff]  ;;  %s315_s14 = scalar_lea.vmem %s689_s3, %s530_s11  ;;  %s323_s17 = scalar_lea.vmem %s690_s4, %s530_s11  ;;  %v370_v22 = vadd.s32 %v369_v20, %v364_v16 }
  0x11   : > { %v341_v1 = vld [vmem:[%s308_s10] sm:$0xff]  ;;  %v383_v9 = vld [vmem:[%s315_s14 + $0x8] sm:$0xff]  ;;  %s333_s21 = scalar_lea.vmem %s692_s6, %s652_s28  ;;  %s329_s27 = scalar_lea.vmem %s691_s5, %s652_s28 }
  0x12   : > { %vm342_vm0 = vcmp.eq.f32.partialorder %v341_v1, 1.0  ;;  %vm346_vm1 = vcmp.eq.f32.partialorder %v341_v1, 0.0  ;;  %v382_v8 = vld [vmem:[%s315_s14] sm:$0xff]  ;;  %v385_v12 = vld [vmem:[%s323_s17 + $0x8] sm:$0xff]  ;;  %v371_v26 = vmul.u32 128, %v370_v22 }
  0x13   : > { %v343_v2 = vsel %vm342_vm0, %v340_v0, 1.0  ;;  %v347_v3 = vsel %vm346_vm1, %v340_v0, 0.0  ;;  %v384_v11 = vld [vmem:[%s323_s17] sm:$0xff]  ;;  %v387_v15 = vsub.f32 %v383_v9, %v385_v12 }
  0x14   : > { %v344_v4 = vmax.f32 %v343_v2, 1e-07  ;;  %v348_v5 = vmax.f32 %v347_v3, 1e-07  ;;  %v386_v14 = vsub.f32 %v382_v8, %v384_v11  ;;  %v372_v32 = vadd.s32 %v371_v26, %v366_v25 }
  0x15   : > { %v389_v18 = vand.u32 2147483647, %v387_v15 }
  0x16   : > { %v345_v6 = vmin.f32 %v344_v4, 0.9999999  ;;  %v349_v7 = vmin.f32 %v348_v5, 0.9999999  ;;  %v388_v17 = vand.u32 2147483647, %v386_v14  ;;  %vm375_vm2 = vcmp.lt.s32.totalorder %v372_v32, %v374_v35 }
  0x18   : > { %563 = vlog2.f32 %v345_v6  ;;  %v358_v13 = vsub.f32 1.0, %v349_v7  ;;  %v350_v19 = vsub.f32 1.0, %v345_v6  ;;  %v390_v21 = vadd.f32 %v389_v18, %v388_v17 }
  0x19   : > { %v356_v24 = vmul.f32 %v349_v7, %v349_v7 }
  0x1a   : > { %565 = vlog2.f32 %v358_v13  ;;  %v351_v23 = vmul.f32 %v350_v19, %v350_v19  ;;  %393 = vst [vmem:[%s333_s21] sm:$0xff] %v390_v21 }
  0x1b   : > { %v357_v30 = vmul.f32 0.75, %v356_v24 }
  0x1c   : > { %v352_v27 = vmul.f32 0.25, %v351_v23 }
  0x25   : > { %v564_v28 = vpop.eup %563 }
  0x26   : > { %v354_v29 = vmul.f32 0.6931472, %v564_v28 }
  0x27   : > { %v566_v31 = vpop.eup %565 }
  0x28   : > { %v355_v33 = vmul.f32 %v354_v29, %v352_v27  ;;  %v360_v34 = vmul.f32 0.6931472, %v566_v31 }
  0x2a   : > { %v361_v36 = vmul.f32 %v360_v34, %v357_v30 }
  0x2c   : > { %v362_v37 = vadd.f32 %v361_v36, %v355_v33 }
  0x2e   : > { %v376_v38 = vsel %vm375_vm2, %v362_v37, 0.0 }
  0x2f   : > { %v377_v39 = vsub.f32 0.0, %v376_v38 }
  0x31   : > { %381 = vst [vmem:[%s329_s27] sm:$0xff] %v377_v39 }
  0x32 PF: > { %s18_s25 = sadd.s32 1, %s589_s25   ;;  %s693_s23 = smov %s585_s24 }
  0x33   : > { %p15_p6 = scmp.ge.s32.totalorder %s18_s25, 4   ;;  %s694_s24 = smov %s696_s0 }
  0x35   :  { %17 = sbr.rel (!%p15_p6) target bundleno = 2 (0x2), region = 91 }

</bundles_post_ra>
